<compile_context>
chip_gen: v7x
topology: tpu7x:2x2x1
jax: 0.10.0
libtpu: 0.0.40
codegen_flags: <defaults>
</compile_context>

<pallas_src>
import jax
import jax.numpy as jnp
from jax.experimental import pallas as pl
from jax.experimental.pallas import tpu as pltpu


def _mish_fast(x):
    # mish(x) = x * tanh(softplus(x)); tanh(log(1+e)) = (n-1)/(n+1), n = (1+e)^2.
    # One exp + one EUP reciprocal (approx) + one Newton step (VPU).  exp arg
    # clamped at 30: beyond that mish(x) == x in f32 and (1+e)^2 stays finite.
    e = jnp.exp(jnp.minimum(x, 30.0))
    t = 1.0 + e
    n = t * t                       # exp(2 * softplus(x))
    d = n + 1.0
    r = pl.reciprocal(d, approx=True)
    r = r * (2.0 - d * r)           # Newton refinement (VPU, free slots)
    return x * (n - 1.0) * r


def actor_kernel(x_ref, p_ref, out_ref):
    hp = p_ref.shape[1]             # padded hidden width (static, multiple of 128)

    x = x_ref[...]                                    # [Bp, 8] (ones col = bias)

    # ---- layer 1: tiny MXU push, bias folded via the ones column of x.
    w1 = p_ref[0:8, :]                                # [8, hp]
    h1 = _mish_fast(jnp.dot(x, w1, preferred_element_type=jnp.float32))

    # ---- layer 2: the dense hidden matmul (hp x hp), lane-dense -> MXU.
    w2 = p_ref[8:8 + hp, :]                           # [hp, hp]
    b2 = p_ref[8 + hp:9 + hp, :]                      # [1, hp]
    h2 = _mish_fast(
        jnp.dot(h1, w2, preferred_element_type=jnp.float32) + b2)

    # ---- layer 3: w3 zero-padded to a full 128-lane output block -> MXU,
    #      giving a lane-dense [Bp, hp] store (no masked vst).
    b3 = p_ref[9 + hp:10 + hp, :]                     # [1, hp]
    w3 = p_ref[16 + hp:16 + 2 * hp, :]                # [hp, hp]
    out_ref[...] = jnp.dot(h2, w3, preferred_element_type=jnp.float32) + b3


def init_params(key, state_dim, n_actions, hidden=64):
    k1, k2, k3 = jax.random.split(key, 3)
    scale = 0.1
    w1 = scale * jax.random.normal(k1, (state_dim, hidden), jnp.float32)
    b1 = jnp.zeros((1, hidden), jnp.float32)
    w2 = scale * jax.random.normal(k2, (hidden, hidden), jnp.float32)
    b2 = jnp.zeros((1, hidden), jnp.float32)
    w3 = scale * jax.random.normal(k3, (hidden, n_actions), jnp.float32)
    b3 = jnp.zeros((1, n_actions), jnp.float32)
    logstds = jnp.full((1, n_actions), 0.1, jnp.float32)   # nn.Parameter(full((n_actions,),0.1))
    return (w1, b1, w2, b2, w3, b3, logstds)


def pack_actor_params(params):
    """One-time repack into a single parameter slab [2*Hp+16, Hp].

    Row layout:  [0:8)        w1 rows + b1 at row K (rest zero)
                 [8:8+Hp)     w2 (zero-padded)
                 [8+Hp:16+Hp) row 0 = b2, row 1 = b3 (lane-padded), rest zero
                 [16+Hp:)     w3 (rows = hidden, cols = n_actions, zero-padded)
    All padding is exact (mish(0)=0, zero rows/cols contribute nothing)."""
    w1, b1, w2, b2, w3, b3, logstds = params
    state_dim, hidden = w1.shape
    n_actions = w3.shape[1]
    assert state_dim + 1 <= 8, "state_dim must fit (with bias) in one 8-row block"
    hp = ((hidden + 127) // 128) * 128
    ph = hp - hidden

    blk_a = jnp.zeros((8, hp), jnp.float32)
    blk_a = blk_a.at[:state_dim, :hidden].set(w1)
    blk_a = blk_a.at[state_dim, :hidden].set(b1.reshape(-1))

    w2p = jnp.pad(w2, ((0, ph), (0, ph)))

    blk_b = jnp.zeros((8, hp), jnp.float32)
    blk_b = blk_b.at[0, :hidden].set(b2.reshape(-1))
    blk_b = blk_b.at[1, :n_actions].set(b3.reshape(-1))

    w3p = jnp.zeros((hp, hp), jnp.float32)
    w3p = w3p.at[:hidden, :n_actions].set(w3)

    slab = jnp.concatenate([blk_a, w2p, blk_b, w3p], axis=0)   # [2*hp+16, hp]
    meta = {"state_dim": state_dim, "n_actions": n_actions, "hp": hp}
    return (slab, logstds, meta)


def actor_forward(x, packed):
    """Returns (means [B, n_actions], stds [n_actions]) — the Normal's parameters."""
    slab, logstds, meta = packed
    k_in = meta["state_dim"]
    n_actions = meta["n_actions"]
    hp = meta["hp"]

    B = x.shape[0]
    bp = max(8, ((B + 7) // 8) * 8)                 # sublane-aligned batch

    # Augment x: [Bp, 8] with a ones column at position K (folds b1), zero pad.
    x_aug = jnp.zeros((bp, 8), jnp.float32)
    x_aug = x_aug.at[:B, :k_in].set(x.astype(jnp.float32))
    x_aug = x_aug.at[:B, k_in].set(1.0)

    vmem = pl.BlockSpec(memory_space=pltpu.MemorySpace.VMEM)
    out = pl.pallas_call(
        actor_kernel,
        out_shape=jax.ShapeDtypeStruct((bp, hp), jnp.float32),  # lane-dense output
        in_specs=[vmem, vmem],
        out_specs=vmem,
    )(x_aug, slab)

    means = out[:B, :n_actions]
    # stds = clamp(exp(logstds), 1e-3, 50): tiny, x-independent -> plain JAX.
    stds = jnp.clip(jnp.exp(logstds), 0.001, 50.0).reshape(-1)
    # TODO(synk): torch.distributions.Normal is just a container; we return its params.
    return means, stds


def actor_forward_ref(x, params):
    # Pure-JAX reference (true mish = x * tanh(softplus(x))), full f32 precision.
    w1, b1, w2, b2, w3, b3, logstds = params

    def mish(v):
        sp = jnp.maximum(v, 0.0) + jnp.log1p(jnp.exp(-jnp.abs(v)))
        return v * jnp.tanh(sp)

    hi = jax.lax.Precision.HIGHEST
    h1 = mish(jnp.dot(x, w1, precision=hi) + b1)
    h2 = mish(jnp.dot(h1, w2, precision=hi) + b2)
    means = jnp.dot(h2, w3, precision=hi) + b3
    stds = jnp.clip(jnp.exp(logstds), 0.001, 50.0)[0]
    return means, stds


if __name__ == "__main__":
    key = jax.random.PRNGKey(0)
    kx, kp = jax.random.split(key)

    # Pendulum-v1-like sizes: state_dim=3, n_actions=1, small batch.
    B, state_dim, n_actions = 8, 3, 1
    x = jax.random.normal(kx, (B, state_dim), jnp.float32)
    params = init_params(kp, state_dim, n_actions)
    packed = pack_actor_params(params)

    means, stds = actor_forward(x, packed)
    jax.block_until_ready((means, stds))

    means_ref, stds_ref = actor_forward_ref(x, params)
    assert means.shape == (B, n_actions) and stds.shape == (n_actions,)
    max_err = float(jnp.max(jnp.abs(means - means_ref)))
    assert jnp.allclose(means, means_ref, atol=5e-5, rtol=5e-5), max_err
    assert jnp.allclose(stds, stds_ref, atol=1e-6)

    print("KERNEL_OK")
</pallas_src>

<mosaic_0001>
module attributes {stable_mosaic.version = 11 : i64} {
  func.func @actor_kernel(%arg0: memref<8x8xf32, #tpu.memory_space<vmem>>, %arg1: memref<272x128xf32, #tpu.memory_space<vmem>>, %arg2: memref<8x128xf32, #tpu.memory_space<vmem>>) attributes {dimension_semantics = [], scalar_prefetch = 0 : i64, scratch_operands = 0 : i64, tpu.core_type = #tpu.core_type<tc>} {
    %c0 = arith.constant 0 : index
    %c0_0 = arith.constant 0 : index
    %0 = vector.load %arg0[%c0, %c0_0] : memref<8x8xf32, #tpu.memory_space<vmem>>, vector<8x8xf32>
    %c0_1 = arith.constant 0 : index
    %c0_2 = arith.constant 0 : index
    %1 = vector.load %arg1[%c0_1, %c0_2] : memref<272x128xf32, #tpu.memory_space<vmem>>, vector<8x128xf32>
    %cst = arith.constant dense<0.000000e+00> : vector<8x128xf32>
    %2 = tpu.matmul %0, %1, %cst {dimension_numbers = #tpu.dot_dimension_numbers<[1], [0], [0], [1], [0, 0, 1, 1], [], []>} : vector<8x8xf32>, vector<8x128xf32>, vector<8x128xf32> -> vector<8x128xf32>
    %cst_3 = arith.constant 3.000000e+01 : f32
    %3 = vector.broadcast %cst_3 : f32 to vector<8x128xf32>
    %4 = arith.minimumf %2, %3 : vector<8x128xf32>
    %5 = math.exp %4 : vector<8x128xf32>
    %cst_4 = arith.constant 1.000000e+00 : f32
    %6 = vector.broadcast %cst_4 : f32 to vector<8x128xf32>
    %7 = arith.addf %6, %5 : vector<8x128xf32>
    %8 = arith.mulf %7, %7 : vector<8x128xf32>
    %cst_5 = arith.constant 1.000000e+00 : f32
    %9 = vector.broadcast %cst_5 : f32 to vector<8x128xf32>
    %10 = arith.addf %8, %9 : vector<8x128xf32>
    %11 = tpu.reciprocal %10 {approx = true} : vector<8x128xf32> -> vector<8x128xf32>
    %12 = arith.mulf %10, %11 : vector<8x128xf32>
    %cst_6 = arith.constant 2.000000e+00 : f32
    %13 = vector.broadcast %cst_6 : f32 to vector<8x128xf32>
    %14 = arith.subf %13, %12 : vector<8x128xf32>
    %15 = arith.mulf %11, %14 : vector<8x128xf32>
    %cst_7 = arith.constant 1.000000e+00 : f32
    %16 = vector.broadcast %cst_7 : f32 to vector<8x128xf32>
    %17 = arith.subf %8, %16 : vector<8x128xf32>
    %18 = arith.mulf %2, %17 : vector<8x128xf32>
    %19 = arith.mulf %18, %15 : vector<8x128xf32>
    %c8 = arith.constant 8 : index
    %c0_8 = arith.constant 0 : index
    %20 = vector.load %arg1[%c8, %c0_8] : memref<272x128xf32, #tpu.memory_space<vmem>>, vector<128x128xf32>
    %c136 = arith.constant 136 : index
    %c0_9 = arith.constant 0 : index
    %21 = vector.load %arg1[%c136, %c0_9] : memref<272x128xf32, #tpu.memory_space<vmem>>, vector<1x128xf32>
    %cst_10 = arith.constant dense<0.000000e+00> : vector<8x128xf32>
    %22 = tpu.matmul %19, %20, %cst_10 {dimension_numbers = #tpu.dot_dimension_numbers<[1], [0], [0], [1], [0, 0, 1, 1], [], []>} : vector<8x128xf32>, vector<128x128xf32>, vector<8x128xf32> -> vector<8x128xf32>
    %23 = vector.broadcast %21 : vector<1x128xf32> to vector<8x128xf32>
    %24 = arith.addf %22, %23 : vector<8x128xf32>
    %cst_11 = arith.constant 3.000000e+01 : f32
    %25 = vector.broadcast %cst_11 : f32 to vector<8x128xf32>
    %26 = arith.minimumf %24, %25 : vector<8x128xf32>
    %27 = math.exp %26 : vector<8x128xf32>
    %cst_12 = arith.constant 1.000000e+00 : f32
    %28 = vector.broadcast %cst_12 : f32 to vector<8x128xf32>
    %29 = arith.addf %28, %27 : vector<8x128xf32>
    %30 = arith.mulf %29, %29 : vector<8x128xf32>
    %cst_13 = arith.constant 1.000000e+00 : f32
    %31 = vector.broadcast %cst_13 : f32 to vector<8x128xf32>
    %32 = arith.addf %30, %31 : vector<8x128xf32>
    %33 = tpu.reciprocal %32 {approx = true} : vector<8x128xf32> -> vector<8x128xf32>
    %34 = arith.mulf %32, %33 : vector<8x128xf32>
    %cst_14 = arith.constant 2.000000e+00 : f32
    %35 = vector.broadcast %cst_14 : f32 to vector<8x128xf32>
    %36 = arith.subf %35, %34 : vector<8x128xf32>
    %37 = arith.mulf %33, %36 : vector<8x128xf32>
    %cst_15 = arith.constant 1.000000e+00 : f32
    %38 = vector.broadcast %cst_15 : f32 to vector<8x128xf32>
    %39 = arith.subf %30, %38 : vector<8x128xf32>
    %40 = arith.mulf %24, %39 : vector<8x128xf32>
    %41 = arith.mulf %40, %37 : vector<8x128xf32>
    %c137 = arith.constant 137 : index
    %c0_16 = arith.constant 0 : index
    %42 = vector.load %arg1[%c137, %c0_16] : memref<272x128xf32, #tpu.memory_space<vmem>>, vector<1x128xf32>
    %c144 = arith.constant 144 : index
    %c0_17 = arith.constant 0 : index
    %43 = vector.load %arg1[%c144, %c0_17] : memref<272x128xf32, #tpu.memory_space<vmem>>, vector<128x128xf32>
    %cst_18 = arith.constant dense<0.000000e+00> : vector<8x128xf32>
    %44 = tpu.matmul %41, %43, %cst_18 {dimension_numbers = #tpu.dot_dimension_numbers<[1], [0], [0], [1], [0, 0, 1, 1], [], []>} : vector<8x128xf32>, vector<128x128xf32>, vector<8x128xf32> -> vector<8x128xf32>
    %45 = vector.broadcast %42 : vector<1x128xf32> to vector<8x128xf32>
    %46 = arith.addf %44, %45 : vector<8x128xf32>
    %c0_19 = arith.constant 0 : index
    %c0_20 = arith.constant 0 : index
    %47 = vector.load %arg2[%c0_19, %c0_20] : memref<8x128xf32, #tpu.memory_space<vmem>>, vector<8x128xf32>
    tpu.vector_store %arg2[%c0_19, %c0_20], %46 {strides = array<i32>} : memref<8x128xf32, #tpu.memory_space<vmem>>, vector<8x128xf32>,
    return
  }
}

</mosaic_0001>

<bundles_post_ra>
// kernel: tpu_custom_call.1
= control target key start
LH: loop header
LB: loop body
LE: loop exit
PB: predicated region body
PF: predicated region fallthrough
CT: control target
= control target key end

     0   :  { %7 = vsyncpa [#allocation3], 0  ;;  %s673_s0 = inlined_call_operand.hbm [shape: f32[8,8], index: 0, kind: input, shape index: {}]   ;;  %s674_s1 = inlined_call_operand.hbm [shape: f32[272,128], index: 1, kind: input, shape index: {}]   ;;  %s675_s2 = inlined_call_operand.hbm [shape: f32[8,128], index: 2, kind: output, shape index: {}]  }
   0x1   :  { %8 = vsyncpa [#allocation6], 0 }
   0x2   :  { %9 = vsyncpa [#allocation4], 0  ;;  %s591_s9 = smov [#allocation2]   ;;  %s592_s11 = smov [#allocation5]  }
   0x3   :  { %s16_s10 = sshll.u32 %s591_s9, 4  ;;  %s25_s12 = sshll.u32 %s592_s11, 4  ;;  %s17_s10 = int_to_ptr.vmem [resolvable:$true] %s16_s10  ;;  %s614_s12 = int_to_ptr.vmem [resolvable:$true] %s25_s12 }
   0x4   :  { %s519_s15 = scalar_lea.hbm %s673_s0, 128 }
   0x5   :  { %p520_p0 = scmp.ne.s32.totalorder %s673_s0, %s519_s15  ;;  %p523_p1 = scmp.lt.u32.totalorder %s519_s15, %s673_s0 }
   0x7   :  { %p525_p2 = pnand %p523_p1, %p520_p0 }
   0x9   :  { %528 = shalt.err (!%p525_p2)
}
   0xa   :  { %s529_s20 = scalar_lea.vmem %s17_s10, 128  ;;  %p534_p4 = scmp.lt.s32.totalorder %s17_s10, %s17_s10 }
   0xb   :  { %p530_p3 = scmp.ne.s32.totalorder %s17_s10, %s529_s20  ;;  %p535_p5 = scmp.lt.s32.totalorder %s529_s20, %s529_s20 }
   0xd   :  { %p536_p6 = por %p535_p5, %p534_p4 }
   0xf   :  { %p537_p7 = pnand %p536_p6, %p530_p3 }
  0x11   :  { %540 = shalt.err (!%p537_p7)
}
  0x12   :  { %19 = dma.hbm_to_vmem [thread:$0]  %s673_s0, 128, %s17_s10, [#allocation3]  }
  0x13   :  { %s541_s25 = scalar_lea.hbm %s674_s1, 4352 }
  0x14   :  { %p542_p8 = scmp.ne.s32.totalorder %s674_s1, %s541_s25  ;;  %p545_p9 = scmp.lt.u32.totalorder %s541_s25, %s674_s1 }
  0x16   :  { %p547_p10 = pnand %p545_p9, %p542_p8 }
  0x18   :  { %550 = shalt.err (!%p547_p10)
}
  0x19   :  { %s551_s30 = scalar_lea.vmem %s614_s12, 4352  ;;  %p556_p12 = scmp.lt.s32.totalorder %s614_s12, %s614_s12 }
  0x1a   :  { %p552_p11 = scmp.ne.s32.totalorder %s614_s12, %s551_s30  ;;  %p557_p13 = scmp.lt.s32.totalorder %s551_s30, %s551_s30 }
  0x1c   :  { %p558_p0 = por %p557_p13, %p556_p12 }
  0x1e   :  { %p559_p1 = pnand %p558_p0, %p552_p11 }
  0x20   :  { %562 = shalt.err (!%p559_p1)
}
  0x21   :  { %s593_s0 = smov 128   ;;  %s594_s3 = smov 8  }
  0x22   :  { %31 = dma.hbm_to_vmem [thread:$0]  %s674_s1, 4352, %s614_s12, [#allocation6], %s593_s0, %s593_s0, %s594_s3  }
  0x23   :  { %585 = dma.done.wait [#allocation3], 128  }
  0x24   :  { %586 = vsyncadd [#allocation3], 4294967168 }
  0x25   :  { %587 = dma.done.wait [#allocation6], 4352  }
  0x26   :  { %588 = vsyncadd [#allocation6], 4294962944  ;;  %v595_v0 = vmov 0.0   ;;  %vm596_vm0 = vmmov 0   ;;  %vm40_vm1 = vcmask 64512   ;;  %v39_v1 = vld [vmem:[#allocation5] sm:$0xff] }
  0x27   :  { %380 = vmatprep.subr.mxu0 %v595_v0  ;;  %382 = vmatprep.mubr.msk.f32.mxu0 %vm596_vm0, %v595_v0  ;;  %v38_v2 = vld [vmem:[#allocation2] sm:$0xff]  ;;  %v127_v3 = vld [vmem:[#allocation5 + $0x8] sm:$0xff]  ;;  %v128_v4 = vld [vmem:[#allocation5 + $0x10] sm:$0xff]  ;;  %v597_v6 = vmov 0.0|0.0   ;;  %s598_s1 = smov [#allocation7]  }
  0x28   :  { %417 = vmatprep.mubr.msk.f32.mxu1 %vm596_vm0, %v595_v0  ;;  %381 = vmatpush3.msra.mxu0 %v39_v1  ;;  %v456_v5 = vpack.c.bf16 %v128_v4, %v127_v3  ;;  %v129_v7 = vld [vmem:[#allocation5 + $0x18] sm:$0xff]  ;;  %v130_v8 = vld [vmem:[#allocation5 + $0x20] sm:$0xff]  ;;  %v131_v10 = vld [vmem:[#allocation5 + $0x28] sm:$0xff]  ;;  %s329_s6 = sshll.u32 %s598_s1, 4  ;;  %s330_s6 = int_to_ptr.vmem [resolvable:$true] %s329_s6 }
  0x29   :  { %383 = vmatmul.mubr.msk.f32.vlgmr.msra.gmra.mrb[0].mxu0 %vm40_vm1, %v38_v2  ;;  %455 = vmatprep.subr.bf16.mxu1 %v597_v6  ;;  %v459_v9 = vpack.c.bf16 %v130_v8, %v129_v7  ;;  %v132_v11 = vld [vmem:[#allocation5 + $0x30] sm:$0xff]  ;;  %v133_v13 = vld [vmem:[#allocation5 + $0x38] sm:$0xff]  ;;  %v134_v14 = vld [vmem:[#allocation5 + $0x40] sm:$0xff]  ;;  %s563_s7 = scalar_lea.vmem %s330_s6, 128  ;;  %p568_p3 = scmp.lt.s32.totalorder %s330_s6, %s330_s6 }
  0x2a   :  { %452 = vmatprep.mubr.msk.f32.mxu0 %vm596_vm0, %v595_v0  ;;  %479 = vmatprep.subr.bf16.mxu0 %v597_v6  ;;  %v462_v12 = vpack.c.bf16 %v132_v11, %v131_v10  ;;  %v465_v15 = vpack.c.bf16 %v134_v14, %v133_v13  ;;  %v135_v16 = vld [vmem:[#allocation5 + $0x48] sm:$0xff]  ;;  %v136_v17 = vld [vmem:[#allocation5 + $0x50] sm:$0xff]  ;;  %v137_v19 = vld [vmem:[#allocation5 + $0x58] sm:$0xff]  ;;  %p564_p2 = scmp.ne.s32.totalorder %s330_s6, %s563_s7  ;;  %p569_p4 = scmp.lt.s32.totalorder %s563_s7, %s563_s7 }
  0x2b   :  { %457 = vmatpush3.bf16.msra.mxu1 %v456_v5  ;;  %v468_v18 = vpack.c.bf16 %v136_v17, %v135_v16  ;;  %v138_v20 = vld [vmem:[#allocation5 + $0x60] sm:$0xff]  ;;  %v139_v22 = vld [vmem:[#allocation5 + $0x68] sm:$0xff]  ;;  %v140_v23 = vld [vmem:[#allocation5 + $0x70] sm:$0xff] }
  0x2c   :  { %458 = vmatprep.subr.bf16.mxu1 %v597_v6  ;;  %v471_v21 = vpack.c.bf16 %v138_v20, %v137_v19  ;;  %v474_v24 = vpack.c.bf16 %v140_v23, %v139_v22  ;;  %v141_v25 = vld [vmem:[#allocation5 + $0x78] sm:$0xff]  ;;  %v142_v26 = vld [vmem:[#allocation5 + $0x80] sm:$0xff]  ;;  %v232_v43 = vld [vmem:[#allocation5 + $0x90] sm:$0xff]  ;;  %p570_p5 = por %p569_p4, %p568_p3 }
  0x2d   :  { %v477_v27 = vpack.c.bf16 %v142_v26, %v141_v25  ;;  %v233_v44 = vld [vmem:[#allocation5 + $0x98] sm:$0xff]  ;;  %v234_v46 = vld [vmem:[#allocation5 + $0xa0] sm:$0xff]  ;;  %v235_v47 = vld [vmem:[#allocation5 + $0xa8] sm:$0xff] }
  0x2e   :  { %v480_v45 = vpack.c.bf16 %v233_v44, %v232_v43  ;;  %v483_v48 = vpack.c.bf16 %v235_v47, %v234_v46  ;;  %v236_v49 = vld [vmem:[#allocation5 + $0xb0] sm:$0xff]  ;;  %v237_v50 = vld [vmem:[#allocation5 + $0xb8] sm:$0xff]  ;;  %v238_v52 = vld [vmem:[#allocation5 + $0xc0] sm:$0xff]  ;;  %p571_p6 = pnand %p570_p5, %p564_p2 }
  0x2f   :  { %460 = vmatpush3.bf16.msra.mxu1 %v459_v9  ;;  %v486_v51 = vpack.c.bf16 %v237_v50, %v236_v49  ;;  %v239_v53 = vld [vmem:[#allocation5 + $0xc8] sm:$0xff]  ;;  %v240_v55 = vld [vmem:[#allocation5 + $0xd0] sm:$0xff]  ;;  %v241_v56 = vld [vmem:[#allocation5 + $0xd8] sm:$0xff] }
  0x30   :  { %461 = vmatprep.subr.bf16.mxu1 %v597_v6  ;;  %481 = vmatpush3.bf16.msra.mxu0 %v480_v45  ;;  %v489_v54 = vpack.c.bf16 %v239_v53, %v238_v52  ;;  %v492_v57 = vpack.c.bf16 %v241_v56, %v240_v55  ;;  %v242_v58 = vld [vmem:[#allocation5 + $0xe0] sm:$0xff]  ;;  %v243_v59 = vld [vmem:[#allocation5 + $0xe8] sm:$0xff]  ;;  %v244_v61 = vld [vmem:[#allocation5 + $0xf0] sm:$0xff] }
  0x31   :  { %482 = vmatprep.subr.bf16.mxu0 %v597_v6  ;;  %v495_v60 = vpack.c.bf16 %v243_v59, %v242_v58  ;;  %v245_v62 = vld [vmem:[#allocation5 + $0xf8] sm:$0xff]  ;;  %v246_v0 = vld [vmem:[#allocation5 + $0x100] sm:$0xff]  ;;  %v247_v1 = vld [vmem:[#allocation5 + $0x108] sm:$0xff] }
  0x32   :  { %v498_v63 = vpack.c.bf16 %v245_v62, %v244_v61  ;;  %v501_v2 = vpack.c.bf16 %v247_v1, %v246_v0  ;;  %v341_v3 = vld [vmem:[#allocation5 + $0x88] ss:$0 sm:$0xff]  ;;  %v343_v20 = vld [vmem:[#allocation5 + $0x89] ss:$0 sm:$0xff] }
  0x33   :  { %463 = vmatpush3.bf16.msra.mxu1 %v462_v12 }
  0x34   :  { %464 = vmatprep.subr.bf16.mxu1 %v597_v6  ;;  %484 = vmatpush3.bf16.msra.mxu0 %v483_v48 }
  0x35   :  { %485 = vmatprep.subr.bf16.mxu0 %v597_v6 }
  0x37   :  { %466 = vmatpush3.bf16.msra.mxu1 %v465_v15 }
  0x38   :  { %467 = vmatprep.subr.bf16.mxu1 %v597_v6  ;;  %487 = vmatpush3.bf16.msra.mxu0 %v486_v51 }
  0x39   :  { %488 = vmatprep.subr.bf16.mxu0 %v597_v6 }
  0x3b   :  { %469 = vmatpush3.bf16.msra.mxu1 %v468_v18 }
  0x3c   :  { %470 = vmatprep.subr.bf16.mxu1 %v597_v6  ;;  %490 = vmatpush3.bf16.msra.mxu0 %v489_v54 }
  0x3d   :  { %491 = vmatprep.subr.bf16.mxu0 %v597_v6 }
  0x3f   :  { %472 = vmatpush3.bf16.msra.mxu1 %v471_v21 }
  0x40   :  { %473 = vmatprep.subr.bf16.mxu1 %v597_v6  ;;  %493 = vmatpush3.bf16.msra.mxu0 %v492_v57 }
  0x41   :  { %494 = vmatprep.subr.bf16.mxu0 %v597_v6 }
  0x43   :  { %475 = vmatpush3.bf16.msra.mxu1 %v474_v24 }
  0x44   :  { %476 = vmatprep.subr.bf16.mxu1 %v597_v6  ;;  %496 = vmatpush3.bf16.msra.mxu0 %v495_v60 }
  0x45   :  { %497 = vmatprep.subr.bf16.mxu0 %v597_v6 }
  0x47   :  { %478 = vmatpush3.bf16.msra.mxu1 %v477_v27 }
  0x48   :  { %499 = vmatpush3.bf16.msra.mxu0 %v498_v63 }
  0x49   :  { %500 = vmatprep.subr.bf16.mxu0 %v597_v6 }
  0x4c   :  { %502 = vmatpush3.bf16.msra.mxu0 %v501_v2 }
  0xfc   :  { %v110_v28 = vpop.f32.mrb[0].mxu0 }
  0xfd   :  { %v114_v29 = vmin.f32 %v110_v28, 30.0  ;;  %v384_v30 = vpop.f32.mrb[1].mxu0 }
  0xff   :  { %v115_v31 = vmul.f32 1.442695, %v114_v29 }
 0x101   :  { %511 = vpow2.f32 %v115_v31 }
 0x10b   :  { %v512_v32 = vpop.eup %511 }
 0x10c   :  { %v117_v33 = vadd.f32 1.0, %v512_v32 }
 0x10e   :  { %v118_v34 = vmul.f32 %v117_v33, %v117_v33 }
 0x110   :  { %v119_v35 = vadd.f32 1.0, %v118_v34  ;;  %v340_v38 = vadd.f32 -1.0, %v118_v34 }
 0x112   :  { %513 = vrcp.f32 %v119_v35  ;;  %v125_v41 = vmul.f32 %v340_v38, %v110_v28 }
 0x11c   :  { %v514_v36 = vpop.eup %513 }
 0x11d   :  { %v121_v37 = vmul.f32 %v514_v36, %v119_v35 }
 0x11f   :  { %v122_v39 = vsub.f32 2.0, %v121_v37 }
 0x121   :  { %v123_v40 = vmul.f32 %v514_v36, %v122_v39 }
 0x123   :  { %v126_v42 = vmul.f32 %v125_v41, %v123_v40 }
 0x125   :  { %418 = vmatmul.mubr.f32.vlgmr.msra.gmra.mrb[0].mxu1 %v126_v42 }
 0x1f8   :  { %v214_v4 = vpop.f32.mrb[0].mxu1 }
 0x1f9   :  { %v215_v5 = vadd.f32 %v341_v3, %v214_v4  ;;  %v419_v7 = vpop.f32.mrb[1].mxu1 }
 0x1fb   :  { %v218_v8 = vmin.f32 %v215_v5, 30.0 }
 0x1fd   :  { %v219_v9 = vmul.f32 1.442695, %v218_v8 }
 0x1ff   :  { %515 = vpow2.f32 %v219_v9 }
 0x209   :  { %v516_v10 = vpop.eup %515 }
 0x20a   :  { %v221_v11 = vadd.f32 1.0, %v516_v10 }
 0x20c   :  { %v222_v12 = vmul.f32 %v221_v11, %v221_v11 }
 0x20e   :  { %v223_v13 = vadd.f32 1.0, %v222_v12  ;;  %v342_v16 = vadd.f32 -1.0, %v222_v12 }
 0x210   :  { %517 = vrcp.f32 %v223_v13  ;;  %v229_v18 = vmul.f32 %v342_v16, %v215_v5 }
 0x21a   :  { %v518_v14 = vpop.eup %517 }
 0x21b   :  { %v225_v15 = vmul.f32 %v518_v14, %v223_v13 }
 0x21d   :  { %v226_v6 = vsub.f32 2.0, %v225_v15 }
 0x21f   :  { %v227_v17 = vmul.f32 %v518_v14, %v226_v6 }
 0x221   :  { %v230_v19 = vmul.f32 %v229_v18, %v227_v17 }
 0x223   :  { %453 = vmatmul.mubr.f32.vlgmr.msra.gmra.mrb[2].mxu0 %v230_v19 }
 0x2f6   :  { %v318_v21 = vpop.f32.mrb[2].mxu0 }
 0x2f7   :  { %v319_v22 = vadd.f32 %v343_v20, %v318_v21  ;;  %v454_v23 = vpop.f32.mrb[3].mxu0 }
 0x2f9   :  { %322 = vst [vmem:[#allocation7] sm:$0xff] %v319_v22 }
 0x2fa   :  { %574 = shalt.err (!%p571_p6)
}
 0x2fb   :  { %s575_s10 = scalar_lea.hbm %s675_s2, 128 }
 0x2fc   :  { %p576_p7 = scmp.ne.s32.totalorder %s675_s2, %s575_s10  ;;  %p579_p8 = scmp.lt.u32.totalorder %s575_s10, %s675_s2 }
 0x2fe   :  { %p581_p9 = pnand %p579_p8, %p576_p7 }
 0x300   :  { %584 = shalt.err (!%p581_p9)
}
 0x301   :  { %332 = dma.vmem_to_hbm [thread:$0]  %s330_s6, 128, %s675_s2, [#allocation4]  }
 0x302   :  { %589 = dma.done.wait [#allocation4], 128  }
 0x303   :  { %590 = vsyncadd [#allocation4], 4294967168 }
 0x304   :  { %336 = vsyncpa [#allocation3], 1 }
 0x305   :  { %337 = vsyncpa [#allocation6], 1 }
 0x306   :  { %338 = vsyncpa [#allocation4], 1 }

</bundles_post_ra>
